<compile_context>
chip_gen: v7x
topology: tpu7x:2x2x1
jax: 0.10.0
libtpu: 0.0.40
codegen_flags: <defaults>
</compile_context>

<pallas_src>
import jax
import jax.numpy as jnp
from jax.experimental import pallas as pl
from jax.experimental.pallas import tpu as pltpu


def _round_up(n, m):
    return ((n + m - 1) // m) * m


def _pad2(a, rows, cols):
    r, c = a.shape
    if (r, c) == (rows, cols):
        return a
    return jnp.pad(a, ((0, rows - r), (0, cols - c)))


def _domain_classifier_kernel(x_ref, w1_ref, b1_ref, w2_ref, b2_ref,
                              w3_ref, b3_ref, logits_ref, tsne_ref):
    # x tile: [TB, K_pad] bf16.  Weights are resident (constant index maps).
    x = x_ref[...]

    # Linear(fc_in, 256) + ReLU   (Dropout -> identity in eval mode)
    h1 = jnp.dot(x, w1_ref[...], preferred_element_type=jnp.float32)
    h1 = jnp.maximum(h1 + b1_ref[...], 0.0)

    # Linear(256, 128) + ReLU     (Dropout -> identity in eval mode)
    h2 = jnp.dot(h1.astype(w2_ref.dtype), w2_ref[...],
                 preferred_element_type=jnp.float32)
    h2 = jnp.maximum(h2 + b2_ref[...], 0.0)

    # Linear(128, domain_class)   (N padded to a lane-dense 128)
    logits = jnp.dot(h2.astype(w3_ref.dtype), w3_ref[...],
                     preferred_element_type=jnp.float32) + b3_ref[...]

    logits_ref[...] = logits.astype(logits_ref.dtype)
    tsne_ref[...] = h2.astype(tsne_ref.dtype)


def domain_classifier(x, w1, b1, w2, b2, w3, b3, *, block_b=512):
    """Fused MLP forward.  x: [B, fc_in] -> (logits [B, C], tsne [B, 128]).

    Weights are stored as [in_features, out_features] (transposed nn.Linear
    layout), so the kernel computes y = x @ W + b directly on the MXU.
    """
    B, fc_in = x.shape
    h1_dim = w1.shape[1]      # 256
    h2_dim = w2.shape[1]      # 128
    num_cls = w3.shape[1]     # domain_class
    assert h1_dim % 128 == 0 and h2_dim % 128 == 0, "hidden dims must be lane-aligned"

    # Pad feature / class dims to the 128-lane width; pad batch to the tile size.
    k_pad = _round_up(fc_in, 128)
    n_pad = _round_up(num_cls, 128)
    tb = min(block_b, _round_up(B, 8))
    b_pad = _round_up(B, tb)
    grid = (b_pad // tb,)

    # bf16 operands for the MXU; biases stay f32 (added on the f32 accumulator).
    x_p = _pad2(x, b_pad, k_pad).astype(jnp.bfloat16)
    w1_p = _pad2(w1, k_pad, h1_dim).astype(jnp.bfloat16)
    w2_p = w2.astype(jnp.bfloat16)
    w3_p = _pad2(w3, h2_dim, n_pad).astype(jnp.bfloat16)
    b1_p = b1.reshape(1, h1_dim).astype(jnp.float32)
    b2_p = b2.reshape(1, h2_dim).astype(jnp.float32)
    b3_p = _pad2(b3.reshape(1, num_cls), 1, n_pad).astype(jnp.float32)

    def resident(shape):
        # Constant block index -> DMA'd once, stays in VMEM across all batch tiles.
        return pl.BlockSpec(shape, lambda i: (0, 0))

    logits_pad, tsne_pad = pl.pallas_call(
        _domain_classifier_kernel,
        grid=grid,
        in_specs=[
            pl.BlockSpec((tb, k_pad), lambda i: (i, 0)),   # streaming x tiles
            resident((k_pad, h1_dim)),
            resident((1, h1_dim)),
            resident((h1_dim, h2_dim)),
            resident((1, h2_dim)),
            resident((h2_dim, n_pad)),
            resident((1, n_pad)),
        ],
        out_specs=[
            pl.BlockSpec((tb, n_pad), lambda i: (i, 0)),   # lane-dense logits
            pl.BlockSpec((tb, h2_dim), lambda i: (i, 0)),  # tsne features
        ],
        out_shape=[
            jax.ShapeDtypeStruct((b_pad, n_pad), jnp.float32),
            jax.ShapeDtypeStruct((b_pad, h2_dim), jnp.float32),
        ],
        compiler_params=pltpu.CompilerParams(
            dimension_semantics=("parallel",),
            vmem_limit_bytes=48 * 1024 * 1024,
        ),
    )(x_p, w1_p, b1_p, w2_p, b2_p, w3_p, b3_p)

    return logits_pad[:B, :num_cls], tsne_pad[:B, :]


def _init_params(key, fc_in, num_cls):
    """Deterministic parameter init (uniform, like PyTorch's default Linear init)."""
    ks = jax.random.split(key, 6)

    def lin(kw, kb, fan_in, fan_out):
        bound = 1.0 / jnp.sqrt(fan_in)
        w = jax.random.uniform(kw, (fan_in, fan_out), jnp.float32, -bound, bound)
        b = jax.random.uniform(kb, (fan_out,), jnp.float32, -bound, bound)
        return w, b

    w1, b1 = lin(ks[0], ks[1], fc_in, 256)
    w2, b2 = lin(ks[2], ks[3], 256, 128)
    w3, b3 = lin(ks[4], ks[5], 128, num_cls)
    return w1, b1, w2, b2, w3, b3


if __name__ == "__main__":
    # Small synthetic config consistent with the module:
    #   args.graph_out = 8, args.channels_num = 4, args.adj_num = 2
    #   -> fc_in_dim = 8 * 4 * 2 = 64;  args.domain_class = 4;  batch = 8
    graph_out, channels_num, adj_num, domain_class = 8, 4, 2, 4
    fc_in_dim = graph_out * channels_num * adj_num
    batch = 8

    key = jax.random.PRNGKey(0)
    k_x, k_p = jax.random.split(key)
    x = jax.random.normal(k_x, (batch, fc_in_dim), jnp.float32)
    params = _init_params(k_p, fc_in_dim, domain_class)

    logits, tsne = domain_classifier(x, *params)
    jax.block_until_ready((logits, tsne))

    # Pure-JAX reference with matching bf16 operand rounding / f32 accumulation
    # (eval-mode dropout == identity).
    w1, b1, w2, b2, w3, b3 = params
    bf = lambda a: a.astype(jnp.bfloat16).astype(jnp.float32)
    h1_ref = jnp.maximum(bf(x) @ bf(w1) + b1, 0.0)
    h2_ref = jnp.maximum(bf(h1_ref) @ bf(w2) + b2, 0.0)
    logits_ref = bf(h2_ref) @ bf(w3) + b3

    assert logits.shape == (batch, domain_class)
    assert tsne.shape == (batch, 128)
    assert jnp.allclose(logits, logits_ref, atol=5e-3, rtol=5e-3)
    assert jnp.allclose(tsne, h2_ref, atol=5e-3, rtol=5e-3)

    print("KERNEL_OK")
</pallas_src>

<mosaic_0001>
module attributes {stable_mosaic.version = 11 : i64} {
  func.func @_domain_classifier_kernel(%arg0: i32, %arg1: memref<8x128xbf16, #tpu.memory_space<vmem>>, %arg2: memref<128x256xbf16, #tpu.memory_space<vmem>>, %arg3: memref<1x256xf32, #tpu.memory_space<vmem>>, %arg4: memref<256x128xbf16, #tpu.memory_space<vmem>>, %arg5: memref<1x128xf32, #tpu.memory_space<vmem>>, %arg6: memref<128x128xbf16, #tpu.memory_space<vmem>>, %arg7: memref<1x128xf32, #tpu.memory_space<vmem>>, %arg8: memref<8x128xf32, #tpu.memory_space<vmem>>, %arg9: memref<8x128xf32, #tpu.memory_space<vmem>>) attributes {dimension_semantics = [#tpu.dimension_semantics<parallel>], iteration_bounds = array<i64: 1>, scalar_prefetch = 0 : i64, scratch_operands = 0 : i64, tpu.core_type = #tpu.core_type<tc>, window_params = [{transform_indices = @transform_0, window_bounds = array<i64: 8, 128>}, {pipeline_mode = #tpu.pipeline_mode<synchronous>, transform_indices = @transform_1, window_bounds = array<i64: 128, 256>}, {pipeline_mode = #tpu.pipeline_mode<synchronous>, transform_indices = @transform_2, window_bounds = array<i64: 1, 256>}, {pipeline_mode = #tpu.pipeline_mode<synchronous>, transform_indices = @transform_3, window_bounds = array<i64: 256, 128>}, {pipeline_mode = #tpu.pipeline_mode<synchronous>, transform_indices = @transform_4, window_bounds = array<i64: 1, 128>}, {pipeline_mode = #tpu.pipeline_mode<synchronous>, transform_indices = @transform_5, window_bounds = array<i64: 128, 128>}, {pipeline_mode = #tpu.pipeline_mode<synchronous>, transform_indices = @transform_6, window_bounds = array<i64: 1, 128>}, {transform_indices = @transform_7, window_bounds = array<i64: 8, 128>}, {transform_indices = @transform_8, window_bounds = array<i64: 8, 128>}]} {
    %c0 = arith.constant 0 : index
    %c0_0 = arith.constant 0 : index
    %0 = vector.load %arg1[%c0, %c0_0] : memref<8x128xbf16, #tpu.memory_space<vmem>>, vector<8x128xbf16>
    %c0_1 = arith.constant 0 : index
    %c0_2 = arith.constant 0 : index
    %1 = vector.load %arg2[%c0_1, %c0_2] : memref<128x256xbf16, #tpu.memory_space<vmem>>, vector<128x256xbf16>
    %cst = arith.constant dense<0.000000e+00> : vector<8x256xf32>
    %2 = tpu.matmul %0, %1, %cst {dimension_numbers = #tpu.dot_dimension_numbers<[1], [0], [0], [1], [0, 0, 1, 1], [], []>} : vector<8x128xbf16>, vector<128x256xbf16>, vector<8x256xf32> -> vector<8x256xf32>
    %c0_3 = arith.constant 0 : index
    %c0_4 = arith.constant 0 : index
    %3 = vector.load %arg3[%c0_3, %c0_4] : memref<1x256xf32, #tpu.memory_space<vmem>>, vector<1x256xf32>
    %4 = vector.broadcast %3 : vector<1x256xf32> to vector<8x256xf32>
    %5 = arith.addf %2, %4 : vector<8x256xf32>
    %cst_5 = arith.constant 0.000000e+00 : f32
    %6 = vector.broadcast %cst_5 : f32 to vector<8x256xf32>
    %7 = arith.maximumf %5, %6 : vector<8x256xf32>
    %8 = arith.truncf %7 : vector<8x256xf32> to vector<8x256xbf16>
    %c0_6 = arith.constant 0 : index
    %c0_7 = arith.constant 0 : index
    %9 = vector.load %arg4[%c0_6, %c0_7] : memref<256x128xbf16, #tpu.memory_space<vmem>>, vector<256x128xbf16>
    %cst_8 = arith.constant dense<0.000000e+00> : vector<8x128xf32>
    %10 = tpu.matmul %8, %9, %cst_8 {dimension_numbers = #tpu.dot_dimension_numbers<[1], [0], [0], [1], [0, 0, 1, 1], [], []>} : vector<8x256xbf16>, vector<256x128xbf16>, vector<8x128xf32> -> vector<8x128xf32>
    %c0_9 = arith.constant 0 : index
    %c0_10 = arith.constant 0 : index
    %11 = vector.load %arg5[%c0_9, %c0_10] : memref<1x128xf32, #tpu.memory_space<vmem>>, vector<1x128xf32>
    %12 = vector.broadcast %11 : vector<1x128xf32> to vector<8x128xf32>
    %13 = arith.addf %10, %12 : vector<8x128xf32>
    %cst_11 = arith.constant 0.000000e+00 : f32
    %14 = vector.broadcast %cst_11 : f32 to vector<8x128xf32>
    %15 = arith.maximumf %13, %14 : vector<8x128xf32>
    %16 = arith.truncf %15 : vector<8x128xf32> to vector<8x128xbf16>
    %c0_12 = arith.constant 0 : index
    %c0_13 = arith.constant 0 : index
    %17 = vector.load %arg6[%c0_12, %c0_13] : memref<128x128xbf16, #tpu.memory_space<vmem>>, vector<128x128xbf16>
    %cst_14 = arith.constant dense<0.000000e+00> : vector<8x128xf32>
    %18 = tpu.matmul %16, %17, %cst_14 {dimension_numbers = #tpu.dot_dimension_numbers<[1], [0], [0], [1], [0, 0, 1, 1], [], []>} : vector<8x128xbf16>, vector<128x128xbf16>, vector<8x128xf32> -> vector<8x128xf32>
    %c0_15 = arith.constant 0 : index
    %c0_16 = arith.constant 0 : index
    %19 = vector.load %arg7[%c0_15, %c0_16] : memref<1x128xf32, #tpu.memory_space<vmem>>, vector<1x128xf32>
    %20 = vector.broadcast %19 : vector<1x128xf32> to vector<8x128xf32>
    %21 = arith.addf %18, %20 : vector<8x128xf32>
    %c0_17 = arith.constant 0 : index
    %c0_18 = arith.constant 0 : index
    %22 = vector.load %arg8[%c0_17, %c0_18] : memref<8x128xf32, #tpu.memory_space<vmem>>, vector<8x128xf32>
    tpu.vector_store %arg8[%c0_17, %c0_18], %21 {strides = array<i32>} : memref<8x128xf32, #tpu.memory_space<vmem>>, vector<8x128xf32>,
    %c0_19 = arith.constant 0 : index
    %c0_20 = arith.constant 0 : index
    %23 = vector.load %arg9[%c0_19, %c0_20] : memref<8x128xf32, #tpu.memory_space<vmem>>, vector<8x128xf32>
    tpu.vector_store %arg9[%c0_19, %c0_20], %15 {strides = array<i32>} : memref<8x128xf32, #tpu.memory_space<vmem>>, vector<8x128xf32>,
    return
  }
  func.func @transform_0(%arg0: i32) -> (i32, i32) {
    %c0_i32 = arith.constant 0 : i32
    %c0_i32_0 = arith.constant 0 : i32
    return %arg0, %c0_i32 : i32, i32
  }
  func.func @transform_1(%arg0: i32) -> (i32, i32) {
    %c0_i32 = arith.constant 0 : i32
    %c0_i32_0 = arith.constant 0 : i32
    %c0_i32_1 = arith.constant 0 : i32
    return %c0_i32, %c0_i32_0 : i32, i32
  }
  func.func @transform_2(%arg0: i32) -> (i32, i32) {
    %c0_i32 = arith.constant 0 : i32
    %c0_i32_0 = arith.constant 0 : i32
    %c0_i32_1 = arith.constant 0 : i32
    return %c0_i32, %c0_i32_0 : i32, i32
  }
  func.func @transform_3(%arg0: i32) -> (i32, i32) {
    %c0_i32 = arith.constant 0 : i32
    %c0_i32_0 = arith.constant 0 : i32
    %c0_i32_1 = arith.constant 0 : i32
    return %c0_i32, %c0_i32_0 : i32, i32
  }
  func.func @transform_4(%arg0: i32) -> (i32, i32) {
    %c0_i32 = arith.constant 0 : i32
    %c0_i32_0 = arith.constant 0 : i32
    %c0_i32_1 = arith.constant 0 : i32
    return %c0_i32, %c0_i32_0 : i32, i32
  }
  func.func @transform_5(%arg0: i32) -> (i32, i32) {
    %c0_i32 = arith.constant 0 : i32
    %c0_i32_0 = arith.constant 0 : i32
    %c0_i32_1 = arith.constant 0 : i32
    return %c0_i32, %c0_i32_0 : i32, i32
  }
  func.func @transform_6(%arg0: i32) -> (i32, i32) {
    %c0_i32 = arith.constant 0 : i32
    %c0_i32_0 = arith.constant 0 : i32
    %c0_i32_1 = arith.constant 0 : i32
    return %c0_i32, %c0_i32_0 : i32, i32
  }
  func.func @transform_7(%arg0: i32) -> (i32, i32) {
    %c0_i32 = arith.constant 0 : i32
    %c0_i32_0 = arith.constant 0 : i32
    return %arg0, %c0_i32 : i32, i32
  }
  func.func @transform_8(%arg0: i32) -> (i32, i32) {
    %c0_i32 = arith.constant 0 : i32
    %c0_i32_0 = arith.constant 0 : i32
    return %arg0, %c0_i32 : i32, i32
  }
}

</mosaic_0001>

<bundles_post_ra>
// kernel: tpu_custom_call.1
= control target key start
LH: loop header
LB: loop body
LE: loop exit
PB: predicated region body
PF: predicated region fallthrough
CT: control target
= control target key end

     0   :  { %14 = vsyncpa [#allocation3], 0  ;;  %s994_s0 = inlined_call_operand.hbm [shape: bf16[8,128], index: 0, kind: input, shape index: {}]   ;;  %s995_s1 = inlined_call_operand.hbm [shape: bf16[128,256], index: 1, kind: input, shape index: {}]   ;;  %s996_s2 = inlined_call_operand.vmem [shape: f32[1,256], index: 2, kind: input, shape index: {}]   ;;  %s997_s3 = inlined_call_operand.hbm [shape: bf16[256,128], index: 3, kind: input, shape index: {}]   ;;  %s998_s4 = inlined_call_operand.vmem [shape: f32[1,128], index: 4, kind: input, shape index: {}]   ;;  %s999_s5 = inlined_call_operand.hbm [shape: bf16[128,128], index: 5, kind: input, shape index: {}]   ;;  %s1000_s6 = inlined_call_operand.vmem [shape: f32[1,128], index: 6, kind: input, shape index: {}]   ;;  %s1001_s7 = inlined_call_operand.hbm [shape: f32[8,128], index: 7, kind: output, shape index: {0}]   ;;  %s1002_s8 = inlined_call_operand.hbm [shape: f32[8,128], index: 8, kind: output, shape index: {1}]  }
   0x1   :  { %15 = vsyncpa [#allocation6], 0 }
   0x2   :  { %16 = vsyncpa [#allocation9], 0 }
   0x3   :  { %17 = vsyncpa [#allocation4], 0 }
   0x4   :  { %18 = vsyncpa [#allocation12], 0  ;;  %s855_s27 = smov [#allocation5]   ;;  %s713_s9 = scalar_lea.hbm %s995_s1, 2048 }
   0x5   :  { %s34_s28 = sshll.u32 %s855_s27, 4  ;;  %p714_p0 = scmp.ne.s32.totalorder %s995_s1, %s713_s9  ;;  %s35_s28 = int_to_ptr.vmem [resolvable:$true] %s34_s28 }
   0x6   :  { %p717_p1 = scmp.lt.u32.totalorder %s713_s9, %s995_s1 }
   0x8   :  { %p719_p2 = pnand %p717_p1, %p714_p0 }
   0xa   :  { %722 = shalt.err (!%p719_p2)
}
   0xb   :  { %s723_s14 = scalar_lea.vmem %s35_s28, 2048  ;;  %p728_p4 = scmp.lt.s32.totalorder %s35_s28, %s35_s28 }
   0xc   :  { %p724_p3 = scmp.ne.s32.totalorder %s35_s28, %s723_s14  ;;  %p729_p5 = scmp.lt.s32.totalorder %s723_s14, %s723_s14 }
   0xe   :  { %p730_p6 = por %p729_p5, %p728_p4 }
  0x10   :  { %p731_p7 = pnand %p730_p6, %p724_p3 }
  0x12   :  { %734 = shalt.err (!%p731_p7)
}
  0x13   :  { %s856_s15 = smov 128   ;;  %s857_s16 = smov 8  }
  0x14   :  { %40 = dma.hbm_to_vmem [thread:$0]  %s995_s1, 2048, %s35_s28, [#allocation6], %s856_s15, %s856_s15, %s857_s16  }
  0x15   :  { %s858_s19 = smov [#allocation2]   ;;  %s859_s21 = smov [#allocation7]  }
  0x16   :  { %s25_s20 = sshll.u32 %s858_s19, 4  ;;  %s48_s22 = sshll.u32 %s859_s21, 4  ;;  %s26_s20 = int_to_ptr.vmem [resolvable:$true] %s25_s20  ;;  %s49_s22 = int_to_ptr.vmem [resolvable:$true] %s48_s22 }
  0x17   :  { %s735_s25 = scalar_lea.hbm %s994_s0, 64 }
  0x18   :  { %p736_p8 = scmp.ne.s32.totalorder %s994_s0, %s735_s25  ;;  %p739_p9 = scmp.lt.u32.totalorder %s735_s25, %s994_s0 }
  0x1a   :  { %p741_p10 = pnand %p739_p9, %p736_p8 }
  0x1c   :  { %744 = shalt.err (!%p741_p10)
}
  0x1d   :  { %s745_s1 = scalar_lea.vmem %s26_s20, 64  ;;  %p750_p12 = scmp.lt.s32.totalorder %s26_s20, %s26_s20 }
  0x1e   :  { %p746_p11 = scmp.ne.s32.totalorder %s26_s20, %s745_s1  ;;  %p751_p13 = scmp.lt.s32.totalorder %s745_s1, %s745_s1 }
  0x20   :  { %p752_p0 = por %p751_p13, %p750_p12 }
  0x22   :  { %p753_p1 = pnand %p752_p0, %p746_p11 }
  0x24   :  { %756 = shalt.err (!%p753_p1)
}
  0x25   :  { %28 = dma.hbm_to_vmem [thread:$0]  %s994_s0, 64, %s26_s20, [#allocation3]  }
  0x26   :  { %s757_s12 = scalar_lea.hbm %s997_s3, 2048 }
  0x27   :  { %p758_p2 = scmp.ne.s32.totalorder %s997_s3, %s757_s12  ;;  %p761_p3 = scmp.lt.u32.totalorder %s757_s12, %s997_s3 }
  0x29   :  { %p763_p4 = pnand %p761_p3, %p758_p2 }
  0x2b   :  { %766 = shalt.err (!%p763_p4)
}
  0x2c   :  { %s767_s17 = scalar_lea.vmem %s49_s22, 2048  ;;  %p772_p6 = scmp.lt.s32.totalorder %s49_s22, %s49_s22 }
  0x2d   :  { %p768_p5 = scmp.ne.s32.totalorder %s49_s22, %s767_s17  ;;  %p773_p7 = scmp.lt.s32.totalorder %s767_s17, %s767_s17 }
  0x2f   :  { %p774_p8 = por %p773_p7, %p772_p6 }
  0x31   :  { %p775_p9 = pnand %p774_p8, %p768_p5 }
  0x33   :  { %778 = shalt.err (!%p775_p9)
}
  0x34   :  { %s860_s0 = smov 64   ;;  %s861_s18 = smov 4  }
  0x35   :  { %54 = dma.hbm_to_vmem [thread:$0]  %s997_s3, 2048, %s49_s22, [#allocation6], %s860_s0, %s860_s0, %s861_s18  }
  0x36   :  { %s862_s21 = smov [#allocation8]   ;;  %s779_s26 = scalar_lea.hbm %s999_s5, 1024 }
  0x37   :  { %s62_s23 = sshll.u32 %s862_s21, 4  ;;  %p780_p10 = scmp.ne.s32.totalorder %s999_s5, %s779_s26  ;;  %s63_s23 = int_to_ptr.vmem [resolvable:$true] %s62_s23 }
  0x38   :  { %p783_p11 = scmp.lt.u32.totalorder %s779_s26, %s999_s5 }
  0x3a   :  { %p785_p12 = pnand %p783_p11, %p780_p10 }
  0x3c   :  { %788 = shalt.err (!%p785_p12)
}
  0x3d   :  { %s789_s28 = scalar_lea.vmem %s63_s23, 1024  ;;  %p794_p0 = scmp.lt.s32.totalorder %s63_s23, %s63_s23 }
  0x3e   :  { %p790_p13 = scmp.ne.s32.totalorder %s63_s23, %s789_s28  ;;  %p795_p1 = scmp.lt.s32.totalorder %s789_s28, %s789_s28 }
  0x40   :  { %p796_p2 = por %p795_p1, %p794_p0 }
  0x42   :  { %p797_p3 = pnand %p796_p2, %p790_p13 }
  0x44   :  { %800 = shalt.err (!%p797_p3)
}
  0x45   :  { %68 = dma.hbm_to_vmem [thread:$0]  %s999_s5, 1024, %s63_s23, [#allocation9], %s860_s0, %s860_s0, %s861_s18  }
  0x46   :  { %845 = dma.done.wait [#allocation3], 64  }
  0x47   :  { %846 = vsyncadd [#allocation3], 4294967232 }
  0x48   :  { %847 = dma.done.wait [#allocation6], 4096  }
  0x49   :  { %848 = vsyncadd [#allocation6], 4294963200 }
  0x4a   :  { %849 = dma.done.wait [#allocation9], 1024  }
  0x4b   :  { %850 = vsyncadd [#allocation9], 4294966272  ;;  %v863_v0 = vmov 0   ;;  %v665_v1 = vld [vmem:[#allocation5 + $0x4] ss:$8 sps:$4 sm:$0xff]   ;;  %v693_v15 = vld [vmem:[#allocation7 + $0x50] sm:$0xff]   ;;  %v103_v41 = vlaneseq }
  0x4c   :  { %225 = vmatprep.mubr.bf16.mxu0 %v863_v0  ;;  %v667_v2 = vld [vmem:[#allocation5] ss:$8 sps:$4 sm:$0xff]   ;;  %193 = vmatprep.subr.bf16.mxu0 %v665_v1  ;;  %v668_v3 = vld [vmem:[#allocation5 + $0x14] ss:$8 sps:$4 sm:$0xff]   ;;  %v670_v4 = vld [vmem:[#allocation5 + $0x10] ss:$8 sps:$4 sm:$0xff]  }
  0x4d   :  { %194 = vmatpush1.bf16.msra.mxu0 %v667_v2  ;;  %v671_v5 = vld [vmem:[#allocation5 + $0x24] ss:$8 sps:$4 sm:$0xff]   ;;  %v673_v6 = vld [vmem:[#allocation5 + $0x20] ss:$8 sps:$4 sm:$0xff]   ;;  %v674_v7 = vld [vmem:[#allocation5 + $0x34] ss:$8 sps:$4 sm:$0xff]  }
  0x4e   :  { %195 = vmatprep.subr.bf16.mxu0 %v668_v3  ;;  %v676_v8 = vld [vmem:[#allocation5 + $0x30] ss:$8 sps:$4 sm:$0xff]   ;;  %v677_v9 = vld [vmem:[#allocation5 + $0x44] ss:$8 sps:$4 sm:$0xff]   ;;  %v679_v12 = vld [vmem:[#allocation5 + $0x40] ss:$8 sps:$4 sm:$0xff]  }
  0x4f   :  { %v689_v10 = vld [vmem:[#allocation7 + $0x40] sm:$0xff]   ;;  %v691_v13 = vld [vmem:[#allocation7 + $0x48] sm:$0xff]   ;;  %v680_v16 = vld [vmem:[#allocation5 + $0x54] ss:$8 sps:$4 sm:$0xff]   ;;  %v864_v35 = vmov 0.0   ;;  %v104_v42 = vshrl.u32 %v103_v41, 7 }
  0x50   :  { %v690_v11 = vld [vmem:[#allocation7] sm:$0xff]   ;;  %601 = vmatprep.subr.bf16.mxu1 %v689_v10  ;;  %v692_v14 = vld [vmem:[#allocation7 + $0x8] sm:$0xff]   ;;  %v682_v17 = vld [vmem:[#allocation5 + $0x50] ss:$8 sps:$4 sm:$0xff]   ;;  %vm865_vm0 = vmmov 0   ;;  %s866_s11 = smov [#allocation11]  }
  0x51   :  { %196 = vmatpush1.bf16.msra.mxu0 %v670_v4  ;;  %602 = vmatpush3.bf16.msra.mxu1 %v690_v11  ;;  %v694_v18 = vld [vmem:[#allocation7 + $0x10] sm:$0xff]   ;;  %v695_v19 = vld [vmem:[#allocation7 + $0x58] sm:$0xff]   ;;  %v683_v20 = vld [vmem:[#allocation5 + $0x64] ss:$8 sps:$4 sm:$0xff]   ;;  %v105_v43 = vsub.s32 0, %v104_v42  ;;  %v109_v45 = vsub.s32 1, %v104_v42 }
  0x52   :  { %197 = vmatprep.subr.bf16.mxu0 %v671_v5  ;;  %603 = vmatprep.subr.bf16.mxu1 %v691_v13  ;;  %v685_v21 = vld [vmem:[#allocation5 + $0x60] ss:$8 sps:$4 sm:$0xff]   ;;  %v686_v22 = vld [vmem:[#allocation5 + $0x74] ss:$8 sps:$4 sm:$0xff]   ;;  %v688_v26 = vld [vmem:[#allocation5 + $0x70] ss:$8 sps:$4 sm:$0xff]  }
  0x53   :  { %v696_v23 = vld [vmem:[#allocation7 + $0x18] sm:$0xff]   ;;  %v697_v24 = vld [vmem:[#allocation7 + $0x60] sm:$0xff]   ;;  %v699_v27 = vld [vmem:[#allocation7 + $0x68] sm:$0xff]   ;;  %s544_s12 = sshll.u32 %s866_s11, 4  ;;  %s545_s12 = int_to_ptr.vmem [resolvable:$true] %s544_s12 }
  0x54   :  { %v698_v25 = vld [vmem:[#allocation7 + $0x20] sm:$0xff]   ;;  %v700_v28 = vld [vmem:[#allocation7 + $0x28] sm:$0xff]   ;;  %v84_v29 = vld [vmem:[#allocation2] sm:$0xf]  ;;  %s801_s13 = scalar_lea.vmem %s545_s12, 128  ;;  %p806_p5 = scmp.lt.s32.totalorder %s545_s12, %s545_s12 }
  0x55   :  { %198 = vmatpush1.bf16.msra.mxu0 %v673_v6  ;;  %604 = vmatpush3.bf16.msra.mxu1 %v692_v14  ;;  %v701_v30 = vld [vmem:[#allocation7 + $0x70] sm:$0xff]   ;;  %v703_v32 = vld [vmem:[#allocation7 + $0x78] sm:$0xff]   ;;  %v705_v34 = vld [vmem:[#allocation8] sm:$0xff]   ;;  %p802_p4 = scmp.ne.s32.totalorder %s545_s12, %s801_s13  ;;  %p807_p6 = scmp.lt.s32.totalorder %s801_s13, %s801_s13 }
  0x56   :  { %199 = vmatprep.subr.bf16.mxu0 %v674_v7  ;;  %605 = vmatprep.subr.bf16.mxu1 %v693_v15  ;;  %v702_v31 = vld [vmem:[#allocation7 + $0x30] sm:$0xff]   ;;  %v704_v33 = vld [vmem:[#allocation7 + $0x38] sm:$0xff]   ;;  %v706_v36 = vld [vmem:[#allocation8 + $0x8] sm:$0xff]  }
  0x57   :  { %v707_v37 = vld [vmem:[#allocation8 + $0x10] sm:$0xff]   ;;  %v708_v38 = vld [vmem:[#allocation8 + $0x18] sm:$0xff]   ;;  %v709_v39 = vld [vmem:[#allocation8 + $0x20] sm:$0xff]   ;;  %p808_p7 = por %p807_p6, %p806_p5 }
  0x58   :  { %v710_v40 = vld [vmem:[#allocation8 + $0x28] sm:$0xff]   ;;  %v101_v44 = vld [vmem:[%s996_s2] sm:$0x3]  ;;  %v711_v58 = vld [vmem:[#allocation8 + $0x30] sm:$0xff]  }
  0x59   :  { %200 = vmatpush1.bf16.msra.mxu0 %v676_v8  ;;  %606 = vmatpush3.bf16.msra.mxu1 %v694_v18  ;;  %v106_v46 = vrot.slane %v101_v44, %v105_v43  ;;  %v110_v47 = vrot.slane %v101_v44, %v109_v45  ;;  %v712_v59 = vld [vmem:[#allocation8 + $0x38] sm:$0xff]   ;;  %p809_p8 = pnand %p808_p7, %p802_p4 }
  0x5a   :  { %201 = vmatprep.subr.bf16.mxu0 %v677_v9  ;;  %607 = vmatprep.subr.bf16.mxu1 %v695_v19  ;;  %v575_v61 = vld [vmem:[%s998_s4] ss:$0 sm:$0xff] }
  0x5d   :  { %202 = vmatpush1.bf16.msra.mxu0 %v679_v12  ;;  %608 = vmatpush3.bf16.msra.mxu1 %v696_v23 }
  0x5e   :  { %203 = vmatprep.subr.bf16.mxu0 %v680_v16  ;;  %609 = vmatprep.subr.bf16.mxu1 %v697_v24 }
  0x61   :  { %204 = vmatpush1.bf16.msra.mxu0 %v682_v17  ;;  %610 = vmatpush3.bf16.msra.mxu1 %v698_v25 }
  0x62   :  { %205 = vmatprep.subr.bf16.mxu0 %v683_v20  ;;  %611 = vmatprep.subr.bf16.mxu1 %v699_v27 }
  0x65   :  { %206 = vmatpush1.bf16.msra.mxu0 %v685_v21  ;;  %612 = vmatpush3.bf16.msra.mxu1 %v700_v28 }
  0x66   :  { %207 = vmatprep.subr.bf16.mxu0 %v686_v22  ;;  %613 = vmatprep.subr.bf16.mxu1 %v701_v30 }
  0x69   :  { %208 = vmatpush1.bf16.msra.mxu0 %v688_v26  ;;  %614 = vmatpush3.bf16.msra.mxu1 %v702_v31 }
  0x6a   :  { %615 = vmatprep.subr.bf16.mxu1 %v703_v32  ;;  %632 = vmatprep.subr.bf16.mxu0 %v864_v35 }
  0x6c   :  { %226 = vmatmul.mubr.bf16.vlgmr.msra.gmra.mrb[0].mxu0 %v84_v29 }
  0x6d   :  { %616 = vmatpush3.bf16.msra.mxu1 %v704_v33  ;;  %633 = vmatpush3.bf16.msra.mxu0 %v705_v34 }
  0x6e   :  { %634 = vmatprep.subr.bf16.mxu0 %v864_v35  ;;  %648 = vmatprep.mubr.msk.bf16.mxu0 %vm865_vm0, %v864_v35 }
  0x71   :  { %635 = vmatpush3.bf16.msra.mxu0 %v706_v36 }
  0x72   :  { %636 = vmatprep.subr.bf16.mxu0 %v864_v35 }
  0x75   :  { %637 = vmatpush3.bf16.msra.mxu0 %v707_v37 }
  0x76   :  { %638 = vmatprep.subr.bf16.mxu0 %v864_v35 }
  0x79   :  { %639 = vmatpush3.bf16.msra.mxu0 %v708_v38 }
  0x7a   :  { %640 = vmatprep.subr.bf16.mxu0 %v864_v35 }
  0x7d   :  { %641 = vmatpush3.bf16.msra.mxu0 %v709_v39 }
  0x7e   :  { %642 = vmatprep.subr.bf16.mxu0 %v864_v35 }
  0x81   :  { %643 = vmatpush3.bf16.msra.mxu0 %v710_v40 }
  0x82   :  { %644 = vmatprep.subr.bf16.mxu0 %v864_v35 }
  0x85   :  { %645 = vmatpush3.bf16.msra.mxu0 %v711_v58 }
  0x86   :  { %646 = vmatprep.subr.bf16.mxu0 %v864_v35 }
  0x89   :  { %647 = vmatpush3.bf16.msra.mxu0 %v712_v59 }
 0x13f   :  { %v227_v48 = vpop.f32.mrb[0].mxu0 }
 0x140   :  { %v228_v49 = vadd.f32 %v227_v48, %v106_v46  ;;  %v229_v50 = vpop.f32.mrb[1].mxu0 }
 0x141   :  { %v230_v51 = vadd.f32 %v229_v50, %v110_v47  ;;  %v231_v52 = vpop.f32.mrb[2].mxu0 }
 0x142   :  { %v234_v53 = vmax.f32 %v228_v49, 0.0  ;;  %v232_v54 = vpop.f32.mrb[3].mxu0 }
 0x143   :  { %v235_v55 = vmax.f32 %v230_v51, 0.0 }
 0x144   :  { %v236_v57 = vpack.c.bf16 %v234_v53, %v234_v53 }
 0x145   :  { %v237_v56 = vpack.c.bf16 %v235_v55, %v235_v55 }
 0x147   :  { %405 = vmatprep.mubr.bf16.mxu1 %v237_v56 }
 0x148   :  { %406 = vmatmul.mubr.bf16.vlgmr.msra.gmra.mrb[0].mxu1 %v236_v57 }
 0x21b   :  { %v617_v60 = vpop.f32.mrb[0].mxu1 }
 0x21c   :  { %v618_v62 = vpop.f32.mrb[1].mxu1 }
 0x21d   :  { %v619_v63 = vadd.f32 %v618_v62, %v617_v60  ;;  %v620_v0 = vpop.f32.mrb[2].mxu1 }
 0x21e   :  { %v621_v1 = vpop.f32.mrb[3].mxu1 }
 0x21f   :  { %v408_v2 = vadd.f32 %v619_v63, %v575_v61 }
 0x221   :  { %v413_v3 = vmax.f32 %v408_v2, 0.0 }
 0x223   :  { %v414_v4 = vpack.c.bf16 %v413_v3, %v413_v3  ;;  %527 = vst [vmem:[#allocation11] sm:$0xff] %v413_v3 }
 0x225   :  { %649 = vmatmul.mubr.bf16.vlgmr.msra.gmra.mrb[4].mxu0 %v414_v4 }
 0x226   :  { %812 = shalt.err (!%p809_p8)
}
 0x227   :  { %s813_s15 = scalar_lea.hbm %s1002_s8, 128 }
 0x228   :  { %p814_p9 = scmp.ne.s32.totalorder %s1002_s8, %s813_s15  ;;  %p817_p10 = scmp.lt.u32.totalorder %s813_s15, %s1002_s8 }
 0x22a   :  { %p819_p11 = pnand %p817_p10, %p814_p9 }
 0x22c   :  { %822 = shalt.err (!%p819_p11)
}
 0x22d   :  { %547 = dma.vmem_to_hbm [thread:$0]  %s545_s12, 128, %s1002_s8, [#allocation12]   ;;  %v592_v5 = vld [vmem:[%s1000_s6] ss:$0 sm:$0xff] }
 0x22e   :  { %s867_s24 = smov [#allocation10]  }
 0x22f   :  { %s534_s25 = sshll.u32 %s867_s24, 4  ;;  %s535_s25 = int_to_ptr.vmem [resolvable:$true] %s534_s25 }
 0x230   :  { %s823_s26 = scalar_lea.vmem %s535_s25, 128  ;;  %p828_p13 = scmp.lt.s32.totalorder %s535_s25, %s535_s25 }
 0x231   :  { %p824_p12 = scmp.ne.s32.totalorder %s535_s25, %s823_s26  ;;  %p829_p0 = scmp.lt.s32.totalorder %s823_s26, %s823_s26 }
 0x233   :  { %p830_p1 = por %p829_p0, %p828_p13 }
 0x235   :  { %p831_p2 = pnand %p830_p1, %p824_p12 }
 0x2f8   :  { %v520_v6 = vpop.f32.mrb[4].mxu0 }
 0x2f9   :  { %v521_v7 = vadd.f32 %v592_v5, %v520_v6  ;;  %v650_v8 = vpop.f32.mrb[5].mxu0 }
 0x2fa   :  { %v523_v9 = vpop.f32.mrb[6].mxu0 }
 0x2fb   :  { %526 = vst [vmem:[#allocation10] sm:$0xff] %v521_v7  ;;  %v651_v10 = vpop.f32.mrb[7].mxu0 }
 0x2fc   :  { %834 = shalt.err (!%p831_p2)
}
 0x2fd   :  { %s835_s6 = scalar_lea.hbm %s1001_s7, 128 }
 0x2fe   :  { %p836_p3 = scmp.ne.s32.totalorder %s1001_s7, %s835_s6  ;;  %p839_p4 = scmp.lt.u32.totalorder %s835_s6, %s1001_s7 }
 0x300   :  { %p841_p5 = pnand %p839_p4, %p836_p3 }
 0x302   :  { %844 = shalt.err (!%p841_p5)
}
 0x303   :  { %537 = dma.vmem_to_hbm [thread:$0]  %s535_s25, 128, %s1001_s7, [#allocation4]  }
 0x304   :  { %851 = dma.done.wait [#allocation4], 128  }
 0x305   :  { %852 = vsyncadd [#allocation4], 4294967168 }
 0x306   :  { %853 = dma.done.wait [#allocation12], 128  }
 0x307   :  { %854 = vsyncadd [#allocation12], 4294967168 }
 0x308   :  { %554 = vsyncpa [#allocation3], 1 }
 0x309   :  { %555 = vsyncpa [#allocation6], 1 }
 0x30a   :  { %556 = vsyncpa [#allocation9], 1 }
 0x30b   :  { %557 = vsyncpa [#allocation4], 1 }
 0x30c   :  { %558 = vsyncpa [#allocation12], 1 }

</bundles_post_ra>
